<compile_context>
chip_gen: v6e
topology: v6e:2x2x1
jax: 0.10.0
libtpu: 0.0.40
codegen_flags: <defaults>
</compile_context>

<pallas_src>
import jax
import jax.numpy as jnp
from jax.experimental import pallas as pl
from jax.experimental.pallas import tpu as pltpu

EPS = 1e-5
OUT_PAD = 8          # final output lane pad (true width is 3)


def _cdiv(a, b):
    return -(-a // b)


# ------------------------- hardware-aware knobs ----------------------------- #

def _vmem_limit_bytes():
    """Scoped-VMEM limit ~3/4 of physical VMEM (96 MiB on v5e/v6e's 128 MiB,
    48 MiB on v7x's 64 MiB). Conservative 48 MiB fallback if the query fails."""
    try:
        cap = getattr(pltpu.get_tpu_info(), "vmem_capacity_bytes", None)
    except Exception:
        cap = None
    if not cap:
        cap = 64 * 1024 * 1024
    return max(32 * 1024 * 1024, (int(cap) * 3) // 4)


_SINGLE_BUFFER_OK = None


def _single_buffer_supported():
    """Probe pl.Buffered(1) (single-buffered grid-invariant operands) once."""
    global _SINGLE_BUFFER_OK
    if _SINGLE_BUFFER_OK is not None:
        return _SINGLE_BUFFER_OK
    try:
        def k(x_ref, o_ref):
            o_ref[...] = x_ref[...] + pl.program_id(0).astype(jnp.float32)

        x = jnp.arange(8 * 128, dtype=jnp.float32).reshape(8, 128)
        out = pl.pallas_call(
            k,
            grid=(4,),
            in_specs=[pl.BlockSpec((8, 128), lambda i: (0, 0),
                                   pipeline_mode=pl.Buffered(1))],
            out_specs=pl.BlockSpec((8, 128), lambda i: (i, 0)),
            out_shape=jax.ShapeDtypeStruct((32, 128), jnp.float32),
        )(x)
        expect = x[None] + jnp.arange(4, dtype=jnp.float32)[:, None, None]
        _SINGLE_BUFFER_OK = bool(jnp.allclose(out.reshape(4, 8, 128), expect))
    except Exception:
        _SINGLE_BUFFER_OK = False
    return _SINGLE_BUFFER_OK


def _resident_spec(shape, single_buffer):
    """BlockSpec for a grid-invariant (VMEM-resident) operand."""
    index_map = lambda i: (0,) * len(shape)
    if single_buffer:
        return pl.BlockSpec(shape, index_map, pipeline_mode=pl.Buffered(1))
    return pl.BlockSpec(shape, index_map)


def _choose_tiling(M, tile_m):
    """Pick (rows per tile, num tiles): tm multiple of 8 (sublane), and an even
    tile count >= 2 when possible so the "parallel" grid axis can be split
    across v7x's two TensorCores."""
    if M <= 8:
        return M, 1
    num_tiles = max(2, _cdiv(M, tile_m))
    if num_tiles % 2:
        num_tiles += 1
    tm = _cdiv(_cdiv(M, num_tiles), 8) * 8
    return tm, num_tiles


# ----------------------------- kernels ------------------------------------ #

def _make_pass_first_kernel(mm_dtype):
    """conv1 (1x1, bias dropped) + per-tile channel (sum, sumsq) partials."""
    def kernel(x_ref, w_ref, y_ref, stats_ref):
        y = jnp.dot(x_ref[...].astype(mm_dtype), w_ref[...],
                    preferred_element_type=jnp.float32)
        y_ref[...] = y.astype(y_ref.dtype)
        cout = y.shape[1]
        # Merged stats block: one small output DMA per tile.
        stats_ref[:, 0:1, :] = jnp.sum(y, axis=0, keepdims=True).reshape(1, 1, cout)
        stats_ref[:, 1:2, :] = jnp.sum(y * y, axis=0, keepdims=True).reshape(1, 1, cout)
    return kernel


def _make_pass_mid_kernel(mm_dtype):
    """Folded BN(prev) + ReLU + conv_k (1x1, bias dropped) + stats partials."""
    def kernel(yp_ref, sc_ref, sh_ref, w_ref, y_ref, stats_ref):
        h = jnp.maximum(
            yp_ref[...].astype(jnp.float32) * sc_ref[...] + sh_ref[...], 0.0)
        y = jnp.dot(h.astype(mm_dtype), w_ref[...],
                    preferred_element_type=jnp.float32)
        y_ref[...] = y.astype(y_ref.dtype)
        cout = y.shape[1]
        stats_ref[:, 0:1, :] = jnp.sum(y, axis=0, keepdims=True).reshape(1, 1, cout)
        stats_ref[:, 1:2, :] = jnp.sum(y * y, axis=0, keepdims=True).reshape(1, 1, cout)
    return kernel


def _make_pass_final_kernel(mm_dtype):
    """Folded BN3 + ReLU + conv4 (output padded to OUT_PAD lanes) + bias."""
    def kernel(yp_ref, sc_ref, sh_ref, w_ref, b_ref, o_ref):
        h = jnp.maximum(
            yp_ref[...].astype(jnp.float32) * sc_ref[...] + sh_ref[...], 0.0)
        o = jnp.dot(h.astype(mm_dtype), w_ref[...],
                    preferred_element_type=jnp.float32) + b_ref[...]
        o_ref[...] = o.astype(o_ref.dtype)
    return kernel


# --------------------------- pallas wrappers ------------------------------- #

def _stats_pass(xin, w, scale_shift, *, tm, num_tiles, mm_dtype, store_dtype,
                vmem_limit, single_buffer):
    m_pad, cin = xin.shape
    cout = w.shape[1]

    x_spec = pl.BlockSpec((tm, cin), lambda i: (i, 0))
    w_spec = _resident_spec((cin, cout), single_buffer)
    y_spec = pl.BlockSpec((tm, cout), lambda i: (i, 0))
    p_spec = pl.BlockSpec((1, 2, cout), lambda i: (i, 0, 0))

    if scale_shift is None:
        kernel = _make_pass_first_kernel(mm_dtype)
        args = (xin, w)
        in_specs = [x_spec, w_spec]
    else:
        sc, sh = scale_shift
        vec_spec = _resident_spec((1, cin), single_buffer)
        kernel = _make_pass_mid_kernel(mm_dtype)
        args = (xin, sc, sh, w)
        in_specs = [x_spec, vec_spec, vec_spec, w_spec]

    cost = pl.CostEstimate(
        flops=2 * m_pad * cin * cout,
        transcendentals=0,
        bytes_accessed=(m_pad * cin * jnp.dtype(xin.dtype).itemsize
                        + cin * cout * jnp.dtype(w.dtype).itemsize
                        + m_pad * cout * jnp.dtype(store_dtype).itemsize
                        + num_tiles * 2 * cout * 4))

    y, stats = pl.pallas_call(
        kernel,
        grid=(num_tiles,),
        in_specs=in_specs,
        out_specs=[y_spec, p_spec],
        out_shape=[
            jax.ShapeDtypeStruct((m_pad, cout), store_dtype),
            jax.ShapeDtypeStruct((num_tiles, 2, cout), jnp.float32),
        ],
        compiler_params=pltpu.CompilerParams(
            dimension_semantics=("parallel",),
            vmem_limit_bytes=vmem_limit),
        cost_estimate=cost,
    )(*args)
    return y, stats


def _final_pass(yp, sc, sh, w4p, b4p, *, tm, num_tiles, mm_dtype, vmem_limit,
                single_buffer, out_dtype):
    m_pad, cin = yp.shape
    cout = w4p.shape[1]  # OUT_PAD

    cost = pl.CostEstimate(
        flops=2 * m_pad * cin * cout,
        transcendentals=0,
        bytes_accessed=(m_pad * cin * jnp.dtype(yp.dtype).itemsize
                        + cin * cout * jnp.dtype(w4p.dtype).itemsize
                        + m_pad * cout * jnp.dtype(out_dtype).itemsize))

    out = pl.pallas_call(
        _make_pass_final_kernel(mm_dtype),
        grid=(num_tiles,),
        in_specs=[pl.BlockSpec((tm, cin), lambda i: (i, 0)),
                  _resident_spec((1, cin), single_buffer),
                  _resident_spec((1, cin), single_buffer),
                  _resident_spec((cin, cout), single_buffer),
                  _resident_spec((1, cout), single_buffer)],
        out_specs=pl.BlockSpec((tm, cout), lambda i: (i, 0)),
        out_shape=jax.ShapeDtypeStruct((m_pad, cout), out_dtype),
        compiler_params=pltpu.CompilerParams(
            dimension_semantics=("parallel",),
            vmem_limit_bytes=vmem_limit),
        cost_estimate=cost,
    )(yp, sc, sh, w4p, b4p)
    return out


# --------------------------- BN stats folding ------------------------------- #

def _fold_bn(stats, m, gamma, beta, pad=None):
    """Fold global train-mode batch stats + affine params into per-channel
    scale/shift.  `pad=(n_pad, pad_row)` removes the exact contribution of the
    n_pad padded rows (each equal to the constant f32 row `pad_row`)."""
    s = jnp.sum(stats[:, 0, :], axis=0)
    ss = jnp.sum(stats[:, 1, :], axis=0)
    if pad is not None:
        n_pad, pad_row = pad
        pr = pad_row.reshape(-1).astype(jnp.float32)
        s = s - n_pad * pr
        ss = ss - n_pad * pr * pr
    mean = s / m
    var = jnp.maximum(ss / m - mean * mean, 0.0)   # biased variance (train mode)
    scale = gamma.reshape(-1) * jax.lax.rsqrt(var + EPS)
    shift = beta.reshape(-1) - mean * scale
    return (scale.reshape(1, -1).astype(jnp.float32),
            shift.reshape(1, -1).astype(jnp.float32))


def _pad_row_value(pad_prev_stored, sc, sh, w_next, mm_dtype):
    """f32 row the next stats pass writes into every padded row, mirroring the
    in-kernel math (stored prev -> f32 -> folded BN -> ReLU -> matmul)."""
    h = jnp.maximum(pad_prev_stored.astype(jnp.float32) * sc + sh, 0.0)
    return jnp.dot(h.astype(mm_dtype), w_next, preferred_element_type=jnp.float32)


# ------------------------------- forward ----------------------------------- #

def mlp_adj_forward(x, params, *, tile_m=1024, matmul_dtype=jnp.bfloat16,
                    store_dtype=None):
    """x: (B, N, nlatent) -> (B, N, 3). Matches PyTorch mlpAdj train-mode fwd.

    matmul_dtype: MXU operand dtype (default bf16 -- native on v5e/v6e/v7x,
      f32 accumulate).  Pass jnp.float32 for bit-closer numerics.
    store_dtype:  dtype of the HBM-resident inter-pass activations y1/y2/y3
      (defaults to matmul_dtype).  Stats/BN math is always f32.
    """
    (w1, b1, g1, be1,
     w2, b2, g2, be2,
     w3, b3, g3, be3,
     w4, b4) = params
    # NOTE: b1/b2/b3 are intentionally unused: each conv is immediately
    # followed by *train-mode* BatchNorm whose mean subtraction cancels a
    # per-channel bias exactly.  Re-introduce them if BN mode/placement changes.
    del b1, b2, b3

    if store_dtype is None:
        store_dtype = matmul_dtype
    B, N, C0 = x.shape
    M = B * N
    out_dtype = x.dtype

    tm, num_tiles = _choose_tiling(M, tile_m)
    m_pad = tm * num_tiles
    n_pad = m_pad - M

    xm = x.reshape(M, C0)
    if n_pad:
        xm = jnp.pad(xm, ((0, n_pad), (0, 0)))   # zero rows; stats fixed below

    w1c = w1.astype(matmul_dtype)
    w2c = w2.astype(matmul_dtype)
    w3c = w3.astype(matmul_dtype)
    n_out = w4.shape[1]
    w4p = jnp.pad(w4, ((0, 0), (0, OUT_PAD - n_out))).astype(matmul_dtype)
    b4p = jnp.pad(b4.reshape(1, -1),
                  ((0, 0), (0, OUT_PAD - n_out))).astype(jnp.float32)

    kw = dict(tm=tm, num_tiles=num_tiles, mm_dtype=matmul_dtype,
              store_dtype=store_dtype, vmem_limit=_vmem_limit_bytes(),
              single_buffer=_single_buffer_supported())

    # Pass 1: conv1 + stats.  Padded rows are exactly zero (bias folded away),
    # so they contribute nothing to the layer-1 stats.
    y1, st1 = _stats_pass(xm, w1c, None, **kw)
    sc1, sh1 = _fold_bn(st1, M, g1, be1)

    # Pass 2: BN1 + ReLU + conv2 + stats.
    y2, st2 = _stats_pass(y1, w2c, (sc1, sh1), **kw)
    if n_pad:
        pad1 = jnp.zeros((1, w1c.shape[1]), store_dtype)       # y1 padded rows
        pad2 = _pad_row_value(pad1, sc1, sh1, w2c, matmul_dtype)
        sc2, sh2 = _fold_bn(st2, M, g2, be2, pad=(n_pad, pad2))
    else:
        sc2, sh2 = _fold_bn(st2, M, g2, be2)

    # Pass 3: BN2 + ReLU + conv3 + stats.
    y3, st3 = _stats_pass(y2, w3c, (sc2, sh2), **kw)
    if n_pad:
        pad3 = _pad_row_value(pad2.astype(store_dtype), sc2, sh2, w3c,
                              matmul_dtype)
        sc3, sh3 = _fold_bn(st3, M, g3, be3, pad=(n_pad, pad3))
    else:
        sc3, sh3 = _fold_bn(st3, M, g3, be3)

    # Pass 4: BN3 + ReLU + conv4 + bias; padded rows/lanes sliced off below.
    out = _final_pass(y3, sc3, sh3, w4p, b4p, tm=tm, num_tiles=num_tiles,
                      mm_dtype=matmul_dtype, vmem_limit=kw["vmem_limit"],
                      single_buffer=kw["single_buffer"], out_dtype=out_dtype)
    return out[:M, :n_out].reshape(B, N, n_out)


# ------------------------- params / reference ------------------------------ #

def init_params(key, nlatent):
    """Mimic PyTorch Conv1d default init (uniform +-1/sqrt(fan_in));
    BatchNorm affine: gamma=1, beta=0."""
    dims = [(nlatent, nlatent),
            (nlatent, nlatent // 2),
            (nlatent // 2, nlatent // 4),
            (nlatent // 4, 3)]
    params = []
    for i, (cin, cout) in enumerate(dims):
        key, kw, kb = jax.random.split(key, 3)
        bound = 1.0 / jnp.sqrt(cin)
        params.append(jax.random.uniform(kw, (cin, cout), jnp.float32, -bound, bound))
        params.append(jax.random.uniform(kb, (1, cout), jnp.float32, -bound, bound))
        if i < 3:
            params.append(jnp.ones((1, cout), jnp.float32))   # gamma
            params.append(jnp.zeros((1, cout), jnp.float32))  # beta
    return params


def _bn_train(y, gamma, beta):
    mean = jnp.mean(y, axis=0, keepdims=True)
    var = jnp.mean((y - mean) ** 2, axis=0, keepdims=True)
    return (y - mean) * jax.lax.rsqrt(var + EPS) * gamma + beta


def mlp_adj_reference(x, params):
    """Pure-JAX, fully faithful f32 reference of the PyTorch forward."""
    (w1, b1, g1, be1, w2, b2, g2, be2, w3, b3, g3, be3, w4, b4) = params
    B, N, C = x.shape
    h = x.reshape(B * N, C)
    h = jnp.maximum(_bn_train(h @ w1 + b1, g1, be1), 0.0)
    h = jnp.maximum(_bn_train(h @ w2 + b2, g2, be2), 0.0)
    h = jnp.maximum(_bn_train(h @ w3 + b3, g3, be3), 0.0)
    out = h @ w4 + b4
    return out.reshape(B, N, 3)


# TODO(synk): PyTorch train-mode BatchNorm also updates running_mean/running_var
# buffers as a side effect; that bookkeeping does not affect the forward output
# and is not reproduced here.

if __name__ == "__main__":
    nlatent = 32   # small stand-in for the default 1024
    key = jax.random.PRNGKey(0)
    kx, kp = jax.random.split(key)
    params = init_params(kp, nlatent)

    # Case 1: aligned M (16 rows -> two 8-row tiles), f32 path: tight check.
    B, N = 2, 8
    x = jax.random.normal(kx, (B, N, nlatent), dtype=jnp.float32)
    out = jax.block_until_ready(
        mlp_adj_forward(x, params, matmul_dtype=jnp.float32))
    ref = mlp_adj_reference(x, params)
    assert out.shape == (B, N, 3)
    assert jnp.allclose(out, ref, atol=1e-4, rtol=1e-4), \
        float(jnp.max(jnp.abs(out - ref)))

    # Case 2: ragged M (15 rows -> 2 tiles + 1 padded row), f32 path:
    # exercises the wrapper-side padded-row stats correction.
    B2, N2 = 3, 5
    kx2, _ = jax.random.split(kx)
    x2 = jax.random.normal(kx2, (B2, N2, nlatent), dtype=jnp.float32)
    out2 = jax.block_until_ready(
        mlp_adj_forward(x2, params, matmul_dtype=jnp.float32))
    ref2 = mlp_adj_reference(x2, params)
    assert out2.shape == (B2, N2, 3)
    assert jnp.allclose(out2, ref2, atol=2e-4, rtol=2e-4), \
        float(jnp.max(jnp.abs(out2 - ref2)))

    # Case 3: default fast path (bf16 MXU operands + bf16-stored intermediates,
    # f32 stats/accumulate); loose sanity tolerance vs the f32 reference.
    out3 = jax.block_until_ready(mlp_adj_forward(x2, params))
    assert out3.shape == (B2, N2, 3)
    assert jnp.allclose(out3, ref2, atol=1.5e-1, rtol=1e-1), \
        float(jnp.max(jnp.abs(out3 - ref2)))

    print("KERNEL_OK")
</pallas_src>

<mosaic_0001>
module attributes {stable_mosaic.version = 11 : i64} {
  func.func @k(%arg0: i32, %arg1: memref<8x128xf32, #tpu.memory_space<vmem>>, %arg2: memref<8x128xf32, #tpu.memory_space<vmem>>) attributes {dimension_semantics = [#tpu.dimension_semantics<arbitrary>], iteration_bounds = array<i64: 4>, scalar_prefetch = 0 : i64, scratch_operands = 0 : i64, tpu.core_type = #tpu.core_type<tc>, window_params = [{pipeline_mode = #tpu.pipeline_mode<synchronous>, transform_indices = @transform_0, window_bounds = array<i64: 8, 128>}, {transform_indices = @transform_1, window_bounds = array<i64: 8, 128>}]} {
    %c0 = arith.constant 0 : index
    %c0_0 = arith.constant 0 : index
    %0 = vector.load %arg1[%c0, %c0_0] : memref<8x128xf32, #tpu.memory_space<vmem>>, vector<8x128xf32>
    %1 = arith.sitofp %arg0 : i32 to f32
    %2 = vector.broadcast %1 : f32 to vector<8x128xf32>
    %3 = arith.addf %0, %2 : vector<8x128xf32>
    %c0_1 = arith.constant 0 : index
    %c0_2 = arith.constant 0 : index
    %4 = vector.load %arg2[%c0_1, %c0_2] : memref<8x128xf32, #tpu.memory_space<vmem>>, vector<8x128xf32>
    tpu.vector_store %arg2[%c0_1, %c0_2], %3 {strides = array<i32>} : memref<8x128xf32, #tpu.memory_space<vmem>>, vector<8x128xf32>,
    return
  }
  func.func @transform_0(%arg0: i32) -> (i32, i32) {
    %c0_i32 = arith.constant 0 : i32
    %c0_i32_0 = arith.constant 0 : i32
    %c0_i32_1 = arith.constant 0 : i32
    return %c0_i32, %c0_i32_0 : i32, i32
  }
  func.func @transform_1(%arg0: i32) -> (i32, i32) {
    %c0_i32 = arith.constant 0 : i32
    %c0_i32_0 = arith.constant 0 : i32
    return %arg0, %c0_i32 : i32, i32
  }
}

module attributes {stable_mosaic.version = 11 : i64} {
  func.func @kernel(%arg0: i32, %arg1: memref<8x32xf32, #tpu.memory_space<vmem>>, %arg2: memref<32x32xf32, #tpu.memory_space<vmem>>, %arg3: memref<8x32xf32, #tpu.memory_space<vmem>>, %arg4: memref<1x2x32xf32, #tpu.memory_space<vmem>>) attributes {dimension_semantics = [#tpu.dimension_semantics<parallel>], iteration_bounds = array<i64: 2>, scalar_prefetch = 0 : i64, scratch_operands = 0 : i64, tpu.core_type = #tpu.core_type<tc>, window_params = [{transform_indices = @transform_0, window_bounds = array<i64: 8, 32>}, {pipeline_mode = #tpu.pipeline_mode<synchronous>, transform_indices = @transform_1, window_bounds = array<i64: 32, 32>}, {transform_indices = @transform_2, window_bounds = array<i64: 8, 32>}, {transform_indices = @transform_3, window_bounds = array<i64: 1, 2, 32>}]} {
    %c0 = arith.constant 0 : index
    %c0_0 = arith.constant 0 : index
    %0 = vector.load %arg1[%c0, %c0_0] : memref<8x32xf32, #tpu.memory_space<vmem>>, vector<8x32xf32>
    %c0_1 = arith.constant 0 : index
    %c0_2 = arith.constant 0 : index
    %1 = vector.load %arg2[%c0_1, %c0_2] : memref<32x32xf32, #tpu.memory_space<vmem>>, vector<32x32xf32>
    %cst = arith.constant dense<0.000000e+00> : vector<8x32xf32>
    %2 = tpu.matmul %0, %1, %cst {dimension_numbers = #tpu.dot_dimension_numbers<[1], [0], [0], [1], [0, 0, 1, 1], [], []>} : vector<8x32xf32>, vector<32x32xf32>, vector<8x32xf32> -> vector<8x32xf32>
    %c0_3 = arith.constant 0 : index
    %c0_4 = arith.constant 0 : index
    %3 = vector.load %arg3[%c0_3, %c0_4] : memref<8x32xf32, #tpu.memory_space<vmem>>, vector<8x32xf32>
    tpu.vector_store %arg3[%c0_3, %c0_4], %2 {strides = array<i32>} : memref<8x32xf32, #tpu.memory_space<vmem>>, vector<8x32xf32>,
    %cst_5 = arith.constant dense<0.000000e+00> : vector<32xf32>
    %4 = vector.multi_reduction <add>, %2, %cst_5 [0] : vector<8x32xf32> to vector<32xf32>
    %5 = vector.shape_cast %4 : vector<32xf32> to vector<1x32xf32>
    %6 = vector.shape_cast %5 : vector<1x32xf32> to vector<1x1x32xf32>
    %c0_6 = arith.constant 0 : index
    %c0_7 = arith.constant 0 : index
    %c0_8 = arith.constant 0 : index
    %7 = vector.load %arg4[%c0_6, %c0_7, %c0_8] : memref<1x2x32xf32, #tpu.memory_space<vmem>>, vector<1x1x32xf32>
    tpu.vector_store %arg4[%c0_6, %c0_7, %c0_8], %6 {strides = array<i32>} : memref<1x2x32xf32, #tpu.memory_space<vmem>>, vector<1x1x32xf32>,
    %8 = arith.mulf %2, %2 : vector<8x32xf32>
    %cst_9 = arith.constant dense<0.000000e+00> : vector<32xf32>
    %9 = vector.multi_reduction <add>, %8, %cst_9 [0] : vector<8x32xf32> to vector<32xf32>
    %10 = vector.shape_cast %9 : vector<32xf32> to vector<1x32xf32>
    %11 = vector.shape_cast %10 : vector<1x32xf32> to vector<1x1x32xf32>
    %c0_10 = arith.constant 0 : index
    %c1 = arith.constant 1 : index
    %c0_11 = arith.constant 0 : index
    %12 = vector.load %arg4[%c0_10, %c1, %c0_11] : memref<1x2x32xf32, #tpu.memory_space<vmem>>, vector<1x1x32xf32>
    tpu.vector_store %arg4[%c0_10, %c1, %c0_11], %11 {strides = array<i32>} : memref<1x2x32xf32, #tpu.memory_space<vmem>>, vector<1x1x32xf32>,
    return
  }
  func.func @transform_0(%arg0: i32) -> (i32, i32) {
    %c0_i32 = arith.constant 0 : i32
    %c0_i32_0 = arith.constant 0 : i32
    return %arg0, %c0_i32 : i32, i32
  }
  func.func @transform_1(%arg0: i32) -> (i32, i32) {
    %c0_i32 = arith.constant 0 : i32
    %c0_i32_0 = arith.constant 0 : i32
    %c0_i32_1 = arith.constant 0 : i32
    return %c0_i32, %c0_i32_0 : i32, i32
  }
  func.func @transform_2(%arg0: i32) -> (i32, i32) {
    %c0_i32 = arith.constant 0 : i32
    %c0_i32_0 = arith.constant 0 : i32
    return %arg0, %c0_i32 : i32, i32
  }
  func.func @transform_3(%arg0: i32) -> (i32, i32, i32) {
    %c0_i32 = arith.constant 0 : i32
    %c0_i32_0 = arith.constant 0 : i32
    %c0_i32_1 = arith.constant 0 : i32
    return %arg0, %c0_i32, %c0_i32_0 : i32, i32, i32
  }
}

</mosaic_0001>

<bundles_post_ra>
// kernel: tpu_custom_call.1
= control target key start
LH: loop header
LB: loop body
LE: loop exit
PB: predicated region body
PF: predicated region fallthrough
CT: control target
= control target key end

     0   :  { %6 = vsyncpa [#allocation3], 0  ;;  %s451_s0 = inlined_call_operand.hbm [shape: f32[8,128], index: 0, kind: input, shape index: {}]   ;;  %s452_s1 = inlined_call_operand.hbm [shape: f32[32,128], index: 1, kind: output, shape index: {}]  }
   0x1   :  { %7 = vsyncpa [#allocation4], 0 }
   0x2   :  { %9 = vsyncpa [#allocation4 + $0x1], 0  ;;  %s350_s6 = smov 0   ;;  %s352_s7 = smov 0  }
   0x3   :  { %s354_s8 = smov 0   ;;  %s356_s9 = smov 0  }
   0x4 LB: > { %s371_s10 = sadd.s32 4294967295, %s336_s9   ;;  %s186_s11 = sadd.s32 4294967294, %s336_s9   ;;  %s336_s9 = sphi %s356_s9, %s460_s9   ;;  %s332_s8 = sphi %s354_s8, %s459_s8   ;;  %s328_s7 = sphi %s352_s7, %s458_s7   ;;  %s324_s6 = sphi %s350_s6, %s457_s6  }
   0x5   : > { %s375_s12 = sadd.s32 1, %s336_s9   ;;  %s43_s13 = sadd.s32 1, %s332_s8 }
   0x6   : > { %s40_s14 = ssub.s32 %s336_s9, %s375_s12  ;;  %p53_p0 = scmp.ne.s32.totalorder %s332_s8, %s328_s7 }
   0x7   : > { %p41_p1 = scmp.eq.s32.totalorder %s40_s14, 0  ;;  %p54_p2 = scmp.eq.s32.totalorder %s371_s10, 3 }
   0x8   : > { %p59_p3 = scmp.ne.s32.totalorder %s328_s7, %s324_s6  ;;  %p60_p4 = scmp.eq.s32.totalorder %s186_s11, 3 }
   0x9   : > { %s386_s15 = scalar_select %p41_p1, %s332_s8, %s43_s13  }
   0xa   : > { %p388_p5 = por %p54_p2, %p53_p0  ;;  %p392_p6 = por %p60_p4, %p59_p3 }
   0xb   : > { %p187_p7 = scmp.ge.s32.totalorder %s336_s9, 1  ;;  %p67_p8 = scmp.lt.s32.totalorder %s336_s9, 5 }
   0xc   : > { %s454_s17 = scalar_select %p392_p6, 1, 0 }
   0xd   : > { %p210_p9 = scmp.eq.s32.totalorder %s371_s10, 0  ;;  %p399_p10 = pnand %p187_p7, %p67_p8 }
   0xe   : > { %s338_s19 = smov [#allocation2]  }
   0xf   : > { %s80_s20 = sshll.u32 %s338_s19, 4  ;;  %p202_p11 = pneg %p399_p10  ;;  %s81_s20 = int_to_ptr.vmem [resolvable:$true] %s80_s20 }
  0x10   : > { %s257_s21 = scalar_lea.vmem %s81_s20, 128  ;;  %p265_p3 = scmp.lt.s32.totalorder %s81_s20, %s81_s20 }
  0x11   : > { %p203_p12 = pnand %p210_p9, %p202_p11  ;;  %p258_p0 = scmp.ne.s32.totalorder %s81_s20, %s257_s21 }
  0x12   : > { %p266_p4 = scmp.lt.s32.totalorder %s257_s21, %s257_s21 }
  0x13   : > { %p248_p13 = pneg %p203_p12 }
  0x14   : > { %p267_p6 = por %p266_p4, %p265_p3 }
  0x15   : > { %p260_p1 = pnand %p258_p0, %p248_p13 }
  0x17   : > { %p261_p2 = pneg %p260_p1 }
  0x19   : > { %p268_p7 = pnand %p267_p6, %p261_p2 }
  0x1b   : > { %271 = shalt.err (!%p268_p7)
}
  0x1c   : > { %205 = dma.hbm_to_vmem [thread:$0]  (!%p203_p12), %s451_s0, 128, %s81_s20, [#allocation3]  }
  0x1d   : > { %93 = sbr.rel (%p399_p10) target bundleno = 60 (0x3c), region = 24 }
  0x22   : > { %315 = dma.done.wait (%p210_p9), [#allocation3], 128  }
  0x23   : > { %317 = vsyncadd (%p210_p9), [#allocation3], 4294967168  ;;  %s105_s24 = sand.u32 1, %s328_s7   ;;  %s109_s26 = scvt.s32.f32 %s371_s10  ;;  %v108_v1 = vld [vmem:[#allocation2] sm:$0xff] }
  0x24   : > { %s191_s25 = sshll.u32 %s105_s24, 3  ;;  %s193_s29 = sshll.u32 %s371_s10, 7 }
  0x25   : > { %v110_v0 = vstv %s109_s26  ;;  %s107_s27 = scalar_lea.vmem [#allocation5], %s191_s25  ;;  %s125_s3 = scalar_lea.hbm %s452_s1, %s193_s29 }
  0x26   : > { %s127_s28 = sshll.u32 %s107_s27, 4  ;;  %v111_v2 = vadd.f32 %v110_v0, %v108_v1  ;;  %s114_s4 = scalar_lea.sflag [#allocation4], %s105_s24  ;;  %s128_s28 = int_to_ptr.vmem [resolvable:$true] %s127_s28 }
  0x27   : > { %s272_s5 = scalar_lea.vmem %s128_s28, 128  ;;  %s339_s11 = smov [#allocation5]  }
  0x28   : > { %112 = vst [vmem:[%s107_s27] sm:$0xff] %v111_v2  ;;  %p273_p6 = scmp.ne.s32.totalorder %s128_s28, %s272_s5  ;;  %s276_s13 = sshll.u32 %s339_s11, 4  ;;  %s277_s13 = int_to_ptr.vmem [resolvable:$false] %s276_s13 }
  0x29   : > { %s278_s14 = scalar_lea.vmem %s277_s13, 256  ;;  %p279_p10 = scmp.lt.s32.totalorder %s128_s28, %s277_s13 }
  0x2a   : > { %p274_p8 = pnand %p273_p6, %p388_p5  ;;  %p280_p11 = scmp.lt.s32.totalorder %s278_s14, %s272_s5 }
  0x2c   : > { %p275_p9 = pneg %p274_p8  ;;  %p281_p12 = por %p280_p11, %p279_p10 }
  0x2e   : > { %p282_p13 = pnand %p281_p12, %p275_p9 }
  0x30   : > { %285 = shalt.err (!%p282_p13)
}
  0x31   : > { %s286_s10 = scalar_lea.hbm %s125_s3, 128  ;;  %s290_s20 = scalar_lea.hbm %s452_s1, 512 }
  0x32   : > { %p287_p0 = scmp.ne.s32.totalorder %s125_s3, %s286_s10  ;;  %p291_p3 = scmp.lt.s32.totalorder %s125_s3, %s452_s1 }
  0x33   : > { %p292_p4 = scmp.lt.s32.totalorder %s290_s20, %s286_s10 }
  0x34   : > { %p288_p1 = pnand %p287_p0, %p388_p5 }
  0x35   : > { %p293_p7 = por %p292_p4, %p291_p3 }
  0x36   : > { %p289_p2 = pneg %p288_p1 }
  0x38   : > { %p294_p6 = pnand %p293_p7, %p289_p2 }
  0x3a   : > { %297 = shalt.err (!%p294_p6)
}
  0x3b   : > { %200 = dma.vmem_to_hbm [thread:$0]  (%p388_p5), %s128_s28, 128, %s125_s3, %s114_s4  }
  0x3c PF: > { %p212_p8 = scmp.ge.s32.totalorder %s336_s9, 2  ;;  %s139_s23 = sand.u32 1, %s324_s6  }
  0x3d   : > { %p456_p9 = scmp.ne.s32.totalorder %s454_s17, 0  ;;  %s140_s24 = scalar_lea.sflag [#allocation4], %s139_s23 }
  0x3f   : > { %p207_p10 = pnand %p212_p8, %p456_p9 }
  0x41   : > { %p208_p11 = pneg %p207_p10 }
  0x43   : > { %319 = dma.done.wait (%p208_p11), %s140_s24, 128  }
  0x44   : > { %321 = vsyncadd (%p208_p11), %s140_s24, 4294967168  ;;  %p12_p12 = scmp.ge.s32.totalorder %s375_s12, 6   ;;  %s457_s6 = smov %s328_s7 }
  0x45   : > { %s458_s7 = smov %s332_s8  ;;  %s459_s8 = smov %s386_s15 }
  0x46   : > { %s460_s9 = smov %s375_s12  ;;  %14 = sbr.rel (!%p12_p12) target bundleno = 4 (0x4), region = 61 }
  0x4b   :  { %145 = vsyncpa [#allocation3], 1 }
  0x4c   :  { %147 = vsyncpa [#allocation3 + $0x1], 1 }
  0x4d   :  { %148 = vsyncpa [#allocation4], 1 }
  0x4e   :  { %150 = vsyncpa [#allocation4 + $0x1], 1 }

// kernel: tpu_custom_call.1
= control target key start
LH: loop header
LB: loop body
LE: loop exit
PB: predicated region body
PF: predicated region fallthrough
CT: control target
= control target key end

     0   :  { %9 = vsyncpa [#allocation3], 0  ;;  %s924_s0 = inlined_call_operand.hbm [shape: f32[16,32], index: 0, kind: input, shape index: {}]   ;;  %s925_s1 = inlined_call_operand.hbm [shape: f32[32,32], index: 1, kind: input, shape index: {}]   ;;  %s926_s2 = inlined_call_operand.hbm [shape: f32[16,32], index: 2, kind: output, shape index: {0}]   ;;  %s927_s3 = inlined_call_operand.hbm [shape: f32[2,2,32], index: 3, kind: output, shape index: {1}]  }
   0x1   :  { %11 = vsyncpa [#allocation3 + $0x1], 0 }
   0x2   :  { %12 = vsyncpa [#allocation6], 0 }
   0x3   :  { %13 = vsyncpa [#allocation4], 0 }
   0x4   :  { %15 = vsyncpa [#allocation4 + $0x1], 0 }
   0x5   :  { %16 = vsyncpa [#allocation9], 0 }
   0x6   :  { %18 = vsyncpa [#allocation9 + $0x1], 0  ;;  %s736_s12 = smov 0   ;;  %s738_s13 = smov 0  }
   0x7   :  { %s740_s14 = smov 0   ;;  %s742_s15 = smov 0  }
   0x8 LB: > { %s757_s16 = sadd.s32 4294967295, %s706_s15   ;;  %s454_s17 = sadd.s32 4294967294, %s706_s15   ;;  %s706_s15 = sphi %s742_s15, %s949_s15   ;;  %s702_s14 = sphi %s740_s14, %s948_s14   ;;  %s698_s13 = sphi %s738_s13, %s947_s13   ;;  %s694_s12 = sphi %s736_s12, %s946_s12  }
   0x9   : > { %p44_p0 = scmp.ne.s32.totalorder %s698_s13, %s694_s12  ;;  %p928_p1 = scmp.eq.s32.totalorder %s757_s16, 0 }
   0xa   : > { %p95_p3 = scmp.eq.s32.totalorder %s454_s17, 1  ;;  %p455_p5 = scmp.ge.s32.totalorder %s706_s15, 1 }
   0xb   : > { %p766_p4 = por %p928_p1, %p44_p0  ;;  %p128_p7 = scmp.lt.s32.totalorder %s706_s15, 3 }
   0xc   : > { %p771_p6 = por %p95_p3, %p44_p0  ;;  %s708_s21 = smov [#allocation5]  }
   0xd   : > { %s932_s18 = scalar_select %p766_p4, 1, 0 }
   0xe   : > { %s933_s19 = scalar_select %p771_p6, 1, 0 }
   0xf   : > { %p776_p8 = pnand %p455_p5, %p128_p7  ;;  %s140_s22 = sshll.u32 %s708_s21, 4  ;;  %s141_s22 = int_to_ptr.vmem [resolvable:$true] %s140_s22 }
  0x10   : > { %s790_s24 = sadd.s32 1, %s706_s15   ;;  %s31_s25 = sadd.s32 1, %s702_s14 }
  0x11   : > { %s934_s20 = scalar_select %p776_p8, 1, 0 }
  0x12   : > { %p498_p9 = pneg %p776_p8  ;;  %s28_s26 = ssub.s32 %s706_s15, %s790_s24 }
  0x13   : > { %s565_s27 = scalar_lea.vmem %s141_s22, 512  ;;  %p573_p5 = scmp.lt.s32.totalorder %s141_s22, %s141_s22 }
  0x14   : > { %p785_p11 = pnand %p498_p9, %p928_p1  ;;  %p566_p13 = scmp.ne.s32.totalorder %s141_s22, %s565_s27 }
  0x15   : > { %p574_p7 = scmp.lt.s32.totalorder %s565_s27, %s565_s27 }
  0x16   : > { %p556_p12 = pneg %p785_p11 }
  0x17   : > { %p575_p10 = por %p574_p7, %p573_p5 }
  0x18   : > { %p568_p0 = pnand %p566_p13, %p556_p12 }
  0x1a   : > { %p569_p3 = pneg %p568_p0 }
  0x1c   : > { %p576_p2 = pnand %p575_p10, %p569_p3 }
  0x1e   : > { %579 = shalt.err (!%p576_p2)
}
  0x1f   : > { %s709_s28 = smov 128   ;;  %s710_s29 = smov 8  }
  0x20   : > { %501 = dma.hbm_to_vmem [thread:$0]  (!%p785_p11), %s925_s1, 512, %s141_s22, [#allocation6], %s709_s28, %s709_s28, %s710_s29  }
  0x21   : > { %p29_p9 = scmp.eq.s32.totalorder %s28_s26, 0  ;;  %p38_p12 = scmp.ne.s32.totalorder %s702_s14, %s698_s13 }
  0x22   : > { %p39_p10 = scmp.eq.s32.totalorder %s706_s15, 0  ;;  %p514_p2 = scmp.lt.s32.totalorder %s706_s15, 2 }
  0x23   : > { %s807_s5 = scalar_select %p29_p9, %s702_s14, %s31_s25  }
  0x24   : > { %p40_p13 = por %p39_p10, %p38_p12  ;;  %p936_p0 = scmp.eq.s32.totalorder %s757_s16, 1 }
  0x25   : > { %s154_s7 = sand.u32 1, %s702_s14   ;;  %s459_s8 = sshll.u32 %s706_s15, 7 }
  0x26   : > { %p811_p3 = por %p936_p0, %p38_p12  ;;  %s458_s9 = sshll.u32 %s154_s7, 3 }
  0x27   : > { %s820_s17 = scalar_lea.hbm %s924_s0, %s459_s8  ;;  %s158_s21 = scalar_lea.vmem [#allocation2], %s458_s9 }
  0x28   : > { %s937_s6 = scalar_select %p811_p3, 1, 0 }
  0x29   : > { %s165_s22 = sshll.u32 %s158_s21, 4  ;;  %p822_p11 = pnand %p514_p2, %p40_p13  ;;  %s166_s22 = int_to_ptr.vmem [resolvable:$true] %s165_s22 }
  0x2a   : > { %s155_s25 = scalar_lea.sflag [#allocation3], %s154_s7  ;;  %s580_s26 = scalar_lea.hbm %s820_s17, 128 }
  0x2b   : > { %p581_p5 = scmp.ne.s32.totalorder %s820_s17, %s580_s26  ;;  %p582_p7 = pneg %p822_p11 }
  0x2c   : > { %s585_s29 = scalar_lea.hbm %s924_s0, 256  ;;  %p586_p10 = scmp.lt.s32.totalorder %s820_s17, %s924_s0 }
  0x2d   : > { %p583_p9 = pnand %p582_p7, %p581_p5  ;;  %p587_p2 = scmp.lt.s32.totalorder %s585_s29, %s580_s26 }
  0x2f   : > { %p584_p12 = pneg %p583_p9  ;;  %p588_p13 = por %p587_p2, %p586_p10 }
  0x31   : > { %p589_p0 = pnand %p588_p13, %p584_p12 }
  0x33   : > { %592 = shalt.err (!%p589_p0)
}
  0x34   : > { %s593_s8 = scalar_lea.vmem %s166_s22, 128  ;;  %s711_s7 = smov [#allocation2]  }
  0x35   : > { %p594_p1 = scmp.ne.s32.totalorder %s166_s22, %s593_s8  ;;  %s598_s9 = sshll.u32 %s711_s7, 4  ;;  %s599_s9 = int_to_ptr.vmem [resolvable:$false] %s598_s9 }
  0x36   : > { %s600_s10 = scalar_lea.vmem %s599_s9, 256  ;;  %p601_p5 = scmp.lt.s32.totalorder %s166_s22, %s599_s9 }
  0x37   : > { %p596_p6 = pnand %p594_p1, %p582_p7  ;;  %p602_p9 = scmp.lt.s32.totalorder %s600_s10, %s593_s8 }
  0x39   : > { %p597_p3 = pneg %p596_p6  ;;  %p603_p4 = por %p602_p9, %p601_p5 }
  0x3b   : > { %p604_p8 = pnand %p603_p4, %p597_p3 }
  0x3d   : > { %607 = shalt.err (!%p604_p8)
}
  0x3e   : > { %505 = dma.hbm_to_vmem [thread:$0]  (!%p822_p11), %s820_s17, 128, %s166_s22, %s155_s25  }
  0x3f   : > { %p939_p12 = scmp.ne.s32.totalorder %s934_s20, 0 }
  0x40   : > { %s843_s11 = sand.u32 (!%p939_p12), 1, %s698_s13   ;;  %p940_p1 = scmp.ne.s32.totalorder (!%p939_p12), %s932_s18, 0 }
  0x41   : > { %174 = sbr.rel (%p939_p12) target bundleno = 315 (0x13b), region = 28  ;;  %s461_s21 = sshll.u32 (!%p939_p12), %s843_s11, 3 }
  0x42   : > { %s177_s26 = scalar_lea.sflag (!%p939_p12), [#allocation3], %s843_s11  ;;  %s180_s27 = scalar_lea.vmem (!%p939_p12), [#allocation2], %s461_s21 }
  0x46   : > { %677 = dma.done.wait (%p940_p1), %s177_s26, 128  }
  0x47   : > { %679 = vsyncadd (%p940_p1), %s177_s26, 4294967168  ;;  %p941_p4 = scmp.eq.s32.totalorder %s757_s16, 0 }
  0x49   : > { %681 = dma.done.wait (%p941_p4), [#allocation6], 512   ;;  %p942_p6 = pmov %p941_p4 }
  0x4a   : > { %v712_v0 = vmov 0.0   ;;  %vm713_vm0 = vmmov 0   ;;  %v216_v1 = vld [vmem:[#allocation5 + $0x18] sm:$0xff]  ;;  %v215_v2 = vld [vmem:[#allocation5 + $0x10] sm:$0xff]  ;;  %v214_v3 = vld [vmem:[#allocation5 + $0x8] sm:$0xff]  ;;  %vm217_vm1 = vcmask 261120  }
  0x4b   : > { %683 = vsyncadd (%p942_p6), [#allocation6], 4294966784  ;;  %477 = vmatprep.subr.mxu0 %v712_v0  ;;  %485 = vmatprep.mubr.msk.f32.mxu0 %vm713_vm0, %v712_v0  ;;  %v213_v4 = vld [vmem:[#allocation5] sm:$0xff]  ;;  %v212_v5 = vld [vmem:[%s180_s27] sm:$0xff]  ;;  %s468_s18 = sshll.u32 %s757_s16, 7  ;;  %s204_s20 = scalar_lea.vmem [#allocation7], %s461_s21 }
  0x4c   : > { %478 = vmatpush3.msra.mxu0 %v216_v1  ;;  %s329_s17 = sshll.u32 %s204_s20, 4  ;;  %s860_s25 = scalar_lea.hbm %s926_s2, %s468_s18  ;;  %s862_s17 = int_to_ptr.vmem [resolvable:$true] %s329_s17 }
  0x4d   : > { %479 = vmatprep.subr.mxu0 %v712_v0  ;;  %s311_s28 = scalar_lea.sflag [#allocation4], %s843_s11  ;;  %s608_s29 = scalar_lea.vmem %s862_s17, 128 }
  0x4e   : > { %480 = vmatpush3.msra.mxu0 %v215_v2  ;;  %p609_p8 = scmp.ne.s32.totalorder %s862_s17, %s608_s29  ;;  %p943_p3 = scmp.ne.s32.totalorder %s937_s6, 0 }
  0x4f   : > { %481 = vmatprep.subr.mxu0 %v712_v0  ;;  %s714_s30 = smov [#allocation7]  }
  0x50   : > { %482 = vmatpush3.msra.mxu0 %v214_v3  ;;  %p610_p11 = pnand %p609_p8, %p943_p3  ;;  %s612_s4 = sshll.u32 %s714_s30, 4  ;;  %s613_s4 = int_to_ptr.vmem [resolvable:$false] %s612_s4 }
  0x51   : > { %483 = vmatprep.subr.mxu0 %v712_v0  ;;  %s614_s8 = scalar_lea.vmem %s613_s4, 256  ;;  %p615_p10 = scmp.lt.s32.totalorder %s862_s17, %s613_s4 }
  0x52   : > { %484 = vmatpush3.msra.mxu0 %v213_v4  ;;  %p611_p7 = pneg %p610_p11  ;;  %p616_p2 = scmp.lt.s32.totalorder %s614_s8, %s608_s29 }
  0x53   : > { %486 = vmatmul.mubr.msk.f32.vlgmr.msra.gmra.mxu0 %vm217_vm1, %v212_v5 }
  0x54   : > { %p617_p13 = por %p616_p2, %p615_p10 }
  0x56   : > { %p618_p0 = pnand %p617_p13, %p611_p7 }
 0x113   : > { %v287_v6 = vpop.f32.mrf.mxu0 }
 0x114   : > { %291 = vst.msk [vmem:[%s204_s20] sm:$0xff] %vm217_vm1, %v287_v6  ;;  %v292_v7 = vsel %vm217_vm1, %v287_v6, 0.0  ;;  %v301_v8 = vmul.f32 %v287_v6, %v287_v6 }
 0x115   : > { %v293_v9 = vrot.slane %v292_v7, 4  ;;  %v487_v10 = vpop.f32.mrf.mxu0 }
 0x116   : > { %621 = shalt.err (!%p618_p0)
}
 0x117   : > { %s622_s7 = scalar_lea.hbm %s860_s25, 128  ;;  %s626_s21 = scalar_lea.hbm %s926_s2, 256 }
 0x118   : > { %p623_p5 = scmp.ne.s32.totalorder %s860_s25, %s622_s7  ;;  %p627_p1 = scmp.lt.s32.totalorder %s860_s25, %s926_s2 }
 0x119   : > { %p628_p4 = scmp.lt.s32.totalorder %s626_s21, %s622_s7 }
 0x11a   : > { %p624_p9 = pnand %p623_p5, %p943_p3 }
 0x11b   : > { %p629_p6 = por %p628_p4, %p627_p1 }
 0x11c   : > { %p625_p12 = pneg %p624_p9 }
 0x11e   : > { %p630_p8 = pnand %p629_p6, %p625_p12 }
 0x120   : > { %633 = shalt.err (!%p630_p8)
}
 0x121   : > { %494 = dma.vmem_to_hbm [thread:$0]  (%p943_p3), %s862_s17, 128, %s860_s25, %s311_s28   ;;  %v302_v11 = vsel %vm217_vm1, %v301_v8, 0.0  ;;  %v294_v12 = vadd.f32 %v293_v9, %v292_v7  ;;  %vm299_vm2 = vcmask 253952  }
 0x122   : > { %v303_v13 = vrot.slane %v302_v11, 4  ;;  %s464_s18 = sshll.u32 %s843_s11, 1  ;;  %s469_s20 = sshll.u32 %s757_s16, 5 }
 0x123   : > { %v295_v14 = vrot.slane %v294_v12, 2  ;;  %s211_s22 = scalar_lea.vmem [#allocation8], %s464_s18  ;;  %s340_s28 = scalar_lea.hbm %s927_s3, %s469_s20 }
 0x124   : > { %v304_v15 = vadd.f32 %v303_v13, %v302_v11  ;;  %s342_s23 = sshll.u32 %s211_s22, 4  ;;  %s316_s29 = scalar_lea.sflag [#allocation9], %s843_s11  ;;  %s343_s23 = int_to_ptr.vmem [resolvable:$true] %s342_s23 }
 0x125   : > { %v296_v16 = vadd.f32 %v295_v14, %v294_v12  ;;  %s634_s30 = scalar_lea.vmem %s343_s23, 32  ;;  %s715_s4 = smov [#allocation8]  }
 0x126   : > { %v305_v17 = vrot.slane %v304_v15, 2  ;;  %p635_p11 = scmp.ne.s32.totalorder %s343_s23, %s634_s30  ;;  %s638_s16 = sshll.u32 %s715_s4, 4  ;;  %s639_s16 = int_to_ptr.vmem [resolvable:$false] %s638_s16 }
 0x127   : > { %v297_v18 = vrot.slane %v296_v16, 1  ;;  %s640_s8 = scalar_lea.vmem %s639_s16, 64  ;;  %p641_p2 = scmp.lt.s32.totalorder %s343_s23, %s639_s16 }
 0x128   : > { %v306_v19 = vadd.f32 %v305_v17, %v304_v15  ;;  %p636_p7 = pnand %p635_p11, %p943_p3  ;;  %p642_p13 = scmp.lt.s32.totalorder %s640_s8, %s634_s30 }
 0x129   : > { %v298_v20 = vadd.f32 %v297_v18, %v296_v16 }
 0x12a   : > { %v307_v21 = vrot.slane %v306_v19, 1  ;;  %p637_p10 = pneg %p636_p7  ;;  %p643_p0 = por %p642_p13, %p641_p2 }
 0x12b   : > { %300 = vst.msk [vmem:[%s211_s22] sm:$0x1] %vm299_vm2, %v298_v20 }
 0x12c   : > { %v308_v22 = vadd.f32 %v307_v21, %v306_v19  ;;  %p644_p5 = pnand %p643_p0, %p637_p10 }
 0x12e   : > { %309 = vst.msk [vmem:[%s211_s22 + $0x1] sm:$0x1] %vm299_vm2, %v308_v22 }
 0x12f   : > { %647 = shalt.err (!%p644_p5)
}
 0x130   : > { %s648_s7 = scalar_lea.hbm %s340_s28, 32  ;;  %s652_s10 = scalar_lea.hbm %s927_s3, 64 }
 0x131   : > { %p649_p9 = scmp.ne.s32.totalorder %s340_s28, %s648_s7  ;;  %p653_p4 = scmp.lt.s32.totalorder %s340_s28, %s927_s3 }
 0x132   : > { %p654_p6 = scmp.lt.s32.totalorder %s652_s10, %s648_s7 }
 0x133   : > { %p650_p12 = pnand %p649_p9, %p943_p3 }
 0x134   : > { %p655_p8 = por %p654_p6, %p653_p4 }
 0x135   : > { %p651_p1 = pneg %p650_p12 }
 0x137   : > { %p656_p11 = pnand %p655_p8, %p651_p1 }
 0x139   : > { %659 = shalt.err (!%p656_p11)
}
 0x13a   : > { %495 = dma.vmem_to_hbm [thread:$0]  (%p943_p3), %s343_s23, 32, %s340_s28, %s316_s29  }
 0x13b PF: > { %s354_s27 = sand.u32 1, %s694_s12   ;;  %p944_p7 = scmp.ne.s32.totalorder %s933_s19, 0 }
 0x13c   : > { %p945_p10 = scmp.ge.s32.totalorder %s706_s15, 2  ;;  %s355_s18 = scalar_lea.sflag [#allocation4], %s354_s27 }
 0x13e   : > { %p507_p2 = pnand %p945_p10, %p944_p7 }
 0x140   : > { %p508_p13 = pneg %p507_p2 }
 0x142   : > { %685 = dma.done.wait (%p508_p13), %s355_s18, 128  }
 0x143   : > { %687 = vsyncadd (%p508_p13), %s355_s18, 4294967168  ;;  %s364_s20 = scalar_lea.sflag [#allocation9], %s354_s27 }
 0x144   : > { %689 = dma.done.wait (%p508_p13), %s364_s20, 32  }
 0x145   : > { %691 = vsyncadd (%p508_p13), %s364_s20, 4294967264  ;;  %p21_p3 = scmp.ge.s32.totalorder %s790_s24, 4   ;;  %s946_s12 = smov %s698_s13 }
 0x146   : > { %s947_s13 = smov %s702_s14  ;;  %s948_s14 = smov %s807_s5 }
 0x147   : > { %s949_s15 = smov %s790_s24  ;;  %23 = sbr.rel (!%p21_p3) target bundleno = 8 (0x8), region = 94 }
 0x14c   :  { %369 = vsyncpa [#allocation3], 1 }
 0x14d   :  { %371 = vsyncpa [#allocation3 + $0x1], 1 }
 0x14e   :  { %372 = vsyncpa [#allocation6], 1 }
 0x14f   :  { %373 = vsyncpa [#allocation4], 1 }
 0x150   :  { %375 = vsyncpa [#allocation4 + $0x1], 1 }
 0x151   :  { %376 = vsyncpa [#allocation9], 1 }
 0x152   :  { %378 = vsyncpa [#allocation9 + $0x1], 1 }

</bundles_post_ra>
